<compile_context>
chip_gen: v7x
topology: tpu7x:2x2x1
jax: 0.10.0
libtpu: 0.0.40
codegen_flags: <defaults>
</compile_context>

<pallas_src>
import functools

import jax
import jax.numpy as jnp
from jax.experimental import pallas as pl
from jax.experimental.pallas import tpu as pltpu

_LANES = 128
_F32_TEMP_TILES = 6          # conservative full-tile f32 temporaries allowance


def _vmem_capacity_bytes() -> int:
    try:
        cap = int(pltpu.get_tpu_info().vmem_capacity_bytes)
        if cap > 0:
            return cap
    except Exception:
        pass
    return 64 * 1024 * 1024   # conservative default (v7x per-TC VMEM)


def _num_tensorcores() -> int:
    try:
        info = pltpu.get_tpu_info()
        for name in ("num_cores", "core_count", "num_tensorcores",
                     "cores_per_chip", "num_cores_per_chip"):
            v = getattr(info, name, None)
            if isinstance(v, int) and 1 <= v <= 8:
                return v
    except Exception:
        pass
    return 1                  # safe default: serial loop, no duplicate blocks


def _choose_tile_n(n, c, itemsize, vmem_capacity):
    # Biggest block that (a) amortizes the ~0.35 us per-grid-step overhead and
    # (b) keeps 2 inputs x 2 pipeline buffers + f32 temporaries inside VMEM.
    sub = 8 if itemsize >= 4 else (16 if itemsize == 2 else 32)
    row_in_bytes = c * itemsize
    row_vmem_bytes = 4 * row_in_bytes + _F32_TEMP_TILES * c * 4
    if vmem_capacity <= (64 << 20):
        target_block = 4 << 20        # v7x-class: 64 MiB per TensorCore
    else:
        target_block = 8 << 20        # v5e/v6e: 128 MiB physical VMEM
    budget = int(0.6 * vmem_capacity)
    tile = min(target_block // max(1, row_in_bytes),
               budget // max(1, row_vmem_bytes))
    tile = max(sub, (tile // sub) * sub)
    if tile >= n:
        tile = n                      # full batch dim is always a legal block
    return tile


def _csloss_kernel(out_ref, tgt_ref, partial_ref, *,
                   n_rows, tile_n, steps, needs_mask):
    p = pl.program_id(0)   # per-core partial index ("parallel")
    i = pl.program_id(1)   # batch-reduction step  ("arbitrary")

    @pl.when(i == 0)
    def _():
        partial_ref[...] = jnp.zeros_like(partial_ref)

    x = out_ref[...].astype(jnp.float32)          # (tile_n, C) logits
    t = tgt_ref[...].astype(jnp.float32)          # (tile_n, C) targets

    # Per-row reductions; log_softmax rewritten so no (tile_n, C) log_sm / z
    # temporary is kept live outside the exp:
    #   sum_c t*(x - m - lse) = sum_c(t*x) - (m + lse) * sum_c(t)
    m = jnp.max(x, axis=1, keepdims=True)                          # (tile_n,1)
    lse = jnp.log(jnp.sum(jnp.exp(x - m), axis=1, keepdims=True))  # (tile_n,1)
    tx = jnp.sum(t * x, axis=1, keepdims=True)                     # (tile_n,1)
    ts = jnp.sum(t, axis=1, keepdims=True)                         # (tile_n,1)
    contrib = tx - (m + lse) * ts                                  # (tile_n,1)

    if needs_mask:
        # Mask only the reduced per-row vector (not the full tiles).  The
        # select is AFTER the reductions, so any NaN/Inf produced by padded
        # tail rows / clamped duplicate blocks stays in the discarded branch.
        b = p * steps + i
        row_ids = b * tile_n + jax.lax.broadcasted_iota(
            jnp.int32, (tile_n, 1), 0)
        contrib = jnp.where(row_ids < n_rows, contrib, 0.0)

    # Scalar step-sum accumulated straight into the resident output block.
    partial_ref[...] += jnp.sum(contrib)


def cs_loss(outputs: jax.Array, targets: jax.Array, *,
            tile_n: int | None = None,
            num_partials: int | None = None) -> jax.Array:
    """Pallas implementation of CSLoss.forward for (N, C) inputs."""
    assert outputs.shape == targets.shape
    assert outputs.ndim == 2
    n, c = outputs.shape
    itemsize = jnp.dtype(outputs.dtype).itemsize

    vmem_capacity = _vmem_capacity_bytes()
    if tile_n is None:
        tile_n = _choose_tile_n(n, c, itemsize, vmem_capacity)
    tile_n = max(1, min(tile_n, n))

    total_blocks = pl.cdiv(n, tile_n)
    if num_partials is None:
        num_partials = _num_tensorcores()     # 2 on v7x, 1 on v5e/v6e
    num_partials = max(1, min(num_partials, total_blocks))
    steps = pl.cdiv(total_blocks, num_partials)
    needs_mask = num_partials * steps * tile_n > n

    def in_map(p_, i_):
        b = p_ * steps + i_
        if num_partials * steps > total_blocks:
            # Clamped duplicate blocks are fully masked inside the kernel.
            b = jnp.minimum(b, total_blocks - 1)
        return (b, 0)

    # VMEM limit derived from the actual footprint (2 inputs x 2 pipeline
    # buffers in native dtype + f32 temporaries + margin), clamped to the
    # part's physical capacity.
    block_in_bytes = tile_n * c * itemsize
    f32_tile_bytes = tile_n * c * 4
    footprint = 4 * block_in_bytes + _F32_TEMP_TILES * f32_tile_bytes + (2 << 20)
    vmem_limit = int(min(max(footprint, 32 << 20),
                         int(0.8 * vmem_capacity), 100 << 20))

    kernel = functools.partial(
        _csloss_kernel, n_rows=n, tile_n=tile_n, steps=steps,
        needs_mask=needs_mask)

    partials = pl.pallas_call(
        kernel,
        out_shape=jax.ShapeDtypeStruct((1, num_partials * _LANES), jnp.float32),
        grid_spec=pltpu.PrefetchScalarGridSpec(
            num_scalar_prefetch=0,
            grid=(num_partials, steps),
            in_specs=[
                pl.BlockSpec((tile_n, c), in_map),
                pl.BlockSpec((tile_n, c), in_map),
            ],
            out_specs=pl.BlockSpec((1, _LANES), lambda p_, i_: (0, p_)),
        ),
        compiler_params=pltpu.CompilerParams(
            dimension_semantics=("parallel", "arbitrary"),
            vmem_limit_bytes=vmem_limit,
        ),
    )(outputs, targets)

    # Every lane within a partial's 128-lane block holds the same value.
    per_core = partials.reshape(num_partials, _LANES)[:, 0]
    return -jnp.sum(per_core) / float(n * c)

    # TODO(synk): for one-hot targets a label-indexed variant (labels via SMEM
    # scalar prefetch) would halve HBM reads; dense path kept for soft targets.


def _reference(outputs, targets):
    # Pure-JAX reference (matches torch.log_softmax semantics).
    log_sm = jax.nn.log_softmax(outputs.astype(jnp.float32), axis=1)
    return -jnp.mean(targets.astype(jnp.float32) * log_sm)


if __name__ == "__main__":
    key = jax.random.PRNGKey(0)
    k1, k2, k3, k4, k5, k6 = jax.random.split(key, 6)

    # Case 1: small (batch=8, classes=32), one-hot targets, single full block.
    N, C = 8, 32
    outputs = jax.random.normal(k1, (N, C), dtype=jnp.float32)
    labels = jax.random.randint(k2, (N,), 0, C)
    targets = jax.nn.one_hot(labels, C, dtype=jnp.float32)

    loss = cs_loss(outputs, targets)
    jax.block_until_ready(loss)
    ref = _reference(outputs, targets)
    assert jnp.allclose(loss, ref, atol=1e-5, rtol=1e-5), (loss, ref)

    # Case 2: exercises batch tiling, tail masking and per-core partial sums.
    N2, C2 = 50, 128
    outputs2 = jax.random.normal(k3, (N2, C2), dtype=jnp.float32)
    targets2 = jax.nn.softmax(
        jax.random.normal(k4, (N2, C2), dtype=jnp.float32), axis=1)

    loss2 = cs_loss(outputs2, targets2, tile_n=16, num_partials=2)
    jax.block_until_ready(loss2)
    ref2 = _reference(outputs2, targets2)
    assert jnp.allclose(loss2, ref2, atol=1e-5, rtol=1e-5), (loss2, ref2)

    # Case 3: bf16 inputs stream natively (half HBM traffic), f32 math inside.
    N3, C3 = 16, 128
    outputs3 = jax.random.normal(k5, (N3, C3), dtype=jnp.float32).astype(jnp.bfloat16)
    targets3 = jax.nn.softmax(
        jax.random.normal(k6, (N3, C3), dtype=jnp.float32), axis=1).astype(jnp.bfloat16)

    loss3 = cs_loss(outputs3, targets3)
    jax.block_until_ready(loss3)
    ref3 = _reference(outputs3, targets3)
    assert jnp.allclose(loss3, ref3, atol=1e-4, rtol=1e-4), (loss3, ref3)

    print("KERNEL_OK")
</pallas_src>

<mosaic_0001>
module attributes {stable_mosaic.version = 11 : i64} {
  func.func @_csloss_kernel(%arg0: i32, %arg1: i32, %arg2: memref<8x32xf32, #tpu.memory_space<vmem>>, %arg3: memref<8x32xf32, #tpu.memory_space<vmem>>, %arg4: memref<1x128xf32, #tpu.memory_space<vmem>>) attributes {dimension_semantics = [#tpu.dimension_semantics<parallel>, #tpu.dimension_semantics<arbitrary>], iteration_bounds = array<i64: 1, 1>, scalar_prefetch = 0 : i64, scratch_operands = 0 : i64, tpu.core_type = #tpu.core_type<tc>, window_params = [{transform_indices = @transform_0, window_bounds = array<i64: 8, 32>}, {transform_indices = @transform_1, window_bounds = array<i64: 8, 32>}, {transform_indices = @transform_2, window_bounds = array<i64: 1, 128>}]} {
    %c0_i32 = arith.constant 0 : i32
    %0 = arith.cmpi eq, %arg1, %c0_i32 : i32
    %1 = arith.extui %0 : i1 to i32
    %c0_i32_0 = arith.constant 0 : i32
    %2 = arith.cmpi ne, %1, %c0_i32_0 : i32
    scf.if %2 {
      %cst_12 = arith.constant 0.000000e+00 : f32
      %29 = vector.broadcast %cst_12 : f32 to vector<1x128xf32>
      %c0_13 = arith.constant 0 : index
      %c0_14 = arith.constant 0 : index
      %30 = vector.load %arg4[%c0_13, %c0_14] : memref<1x128xf32, #tpu.memory_space<vmem>>, vector<1x128xf32>
      tpu.vector_store %arg4[%c0_13, %c0_14], %29 {strides = array<i32>} : memref<1x128xf32, #tpu.memory_space<vmem>>, vector<1x128xf32>,
    } else {
    }
    %c0 = arith.constant 0 : index
    %c0_1 = arith.constant 0 : index
    %3 = vector.load %arg2[%c0, %c0_1] : memref<8x32xf32, #tpu.memory_space<vmem>>, vector<8x32xf32>
    %c0_2 = arith.constant 0 : index
    %c0_3 = arith.constant 0 : index
    %4 = vector.load %arg3[%c0_2, %c0_3] : memref<8x32xf32, #tpu.memory_space<vmem>>, vector<8x32xf32>
    %cst = arith.constant dense<0xFF800000> : vector<8xf32>
    %5 = vector.multi_reduction <maximumf>, %3, %cst [1] : vector<8x32xf32> to vector<8xf32>
    %6 = vector.shape_cast %5 : vector<8xf32> to vector<8x1xf32>
    %7 = vector.broadcast %6 : vector<8x1xf32> to vector<8x32xf32>
    %8 = arith.subf %3, %7 : vector<8x32xf32>
    %9 = math.exp %8 : vector<8x32xf32>
    %cst_4 = arith.constant dense<0.000000e+00> : vector<8xf32>
    %10 = vector.multi_reduction <add>, %9, %cst_4 [1] : vector<8x32xf32> to vector<8xf32>
    %11 = vector.shape_cast %10 : vector<8xf32> to vector<8x1xf32>
    %12 = math.log %11 : vector<8x1xf32>
    %13 = arith.mulf %4, %3 : vector<8x32xf32>
    %cst_5 = arith.constant dense<0.000000e+00> : vector<8xf32>
    %14 = vector.multi_reduction <add>, %13, %cst_5 [1] : vector<8x32xf32> to vector<8xf32>
    %15 = vector.shape_cast %14 : vector<8xf32> to vector<8x1xf32>
    %cst_6 = arith.constant dense<0.000000e+00> : vector<8xf32>
    %16 = vector.multi_reduction <add>, %4, %cst_6 [1] : vector<8x32xf32> to vector<8xf32>
    %17 = vector.shape_cast %16 : vector<8xf32> to vector<8x1xf32>
    %18 = arith.addf %6, %12 : vector<8x1xf32>
    %19 = arith.mulf %18, %17 : vector<8x1xf32>
    %20 = arith.subf %15, %19 : vector<8x1xf32>
    %c0_7 = arith.constant 0 : index
    %c0_8 = arith.constant 0 : index
    %21 = vector.load %arg4[%c0_7, %c0_8] : memref<1x128xf32, #tpu.memory_space<vmem>>, vector<1x128xf32>
    %22 = vector.shape_cast %20 : vector<8x1xf32> to vector<1x8x1xf32>
    %cst_9 = arith.constant dense<0.000000e+00> : vector<1xf32>
    %23 = vector.multi_reduction <add>, %22, %cst_9 [1, 2] : vector<1x8x1xf32> to vector<1xf32>
    %24 = vector.shape_cast %23 : vector<1xf32> to vector<1x1x1xf32>
    %25 = vector.extract %24[0, 0, 0] : f32 from vector<1x1x1xf32>
    %26 = vector.broadcast %25 : f32 to vector<1x128xf32>
    %27 = arith.addf %21, %26 : vector<1x128xf32>
    %c0_10 = arith.constant 0 : index
    %c0_11 = arith.constant 0 : index
    %28 = vector.load %arg4[%c0_10, %c0_11] : memref<1x128xf32, #tpu.memory_space<vmem>>, vector<1x128xf32>
    tpu.vector_store %arg4[%c0_10, %c0_11], %27 {strides = array<i32>} : memref<1x128xf32, #tpu.memory_space<vmem>>, vector<1x128xf32>,
    return
  }
  func.func @transform_0(%arg0: i32, %arg1: i32) -> (i32, i32) {
    %c1_i32 = arith.constant 1 : i32
    %0 = arith.muli %arg0, %c1_i32 : i32
    %1 = arith.addi %0, %arg1 : i32
    %c0_i32 = arith.constant 0 : i32
    %c0_i32_0 = arith.constant 0 : i32
    return %1, %c0_i32 : i32, i32
  }
  func.func @transform_1(%arg0: i32, %arg1: i32) -> (i32, i32) {
    %c1_i32 = arith.constant 1 : i32
    %0 = arith.muli %arg0, %c1_i32 : i32
    %1 = arith.addi %0, %arg1 : i32
    %c0_i32 = arith.constant 0 : i32
    %c0_i32_0 = arith.constant 0 : i32
    return %1, %c0_i32 : i32, i32
  }
  func.func @transform_2(%arg0: i32, %arg1: i32) -> (i32, i32) {
    %c0_i32 = arith.constant 0 : i32
    %c0_i32_0 = arith.constant 0 : i32
    return %c0_i32, %arg0 : i32, i32
  }
}

</mosaic_0001>

<bundles_post_ra>
// kernel: tpu_custom_call.1
= control target key start
LH: loop header
LB: loop body
LE: loop exit
PB: predicated region body
PF: predicated region fallthrough
CT: control target
= control target key end

     0   :  { %7 = vsyncpa [#allocation3], 0  ;;  %s241_s0 = inlined_call_operand.hbm [shape: f32[8,32], index: 0, kind: input, shape index: {}]   ;;  %s242_s1 = inlined_call_operand.hbm [shape: f32[8,32], index: 1, kind: input, shape index: {}]   ;;  %s243_s2 = inlined_call_operand.hbm [shape: f32[1,128], index: 2, kind: output, shape index: {}]  }
   0x1   :  { %8 = vsyncpa [#allocation6], 0 }
   0x2   :  { %9 = vsyncpa [#allocation4], 0  ;;  %s186_s9 = smov [#allocation2]   ;;  %s187_s11 = smov [#allocation5]  }
   0x3   :  { %s19_s10 = sshll.u32 %s186_s9, 4  ;;  %s32_s12 = sshll.u32 %s187_s11, 4  ;;  %s20_s10 = int_to_ptr.vmem [resolvable:$true] %s19_s10  ;;  %s33_s12 = int_to_ptr.vmem [resolvable:$true] %s32_s12 }
   0x4   :  { %s114_s15 = scalar_lea.hbm %s241_s0, 128 }
   0x5   :  { %p115_p0 = scmp.ne.s32.totalorder %s241_s0, %s114_s15  ;;  %p118_p1 = scmp.lt.u32.totalorder %s114_s15, %s241_s0 }
   0x7   :  { %p120_p2 = pnand %p118_p1, %p115_p0 }
   0x9   :  { %123 = shalt.err (!%p120_p2)
}
   0xa   :  { %s124_s20 = scalar_lea.vmem %s20_s10, 128  ;;  %p129_p4 = scmp.lt.s32.totalorder %s20_s10, %s20_s10 }
   0xb   :  { %p125_p3 = scmp.ne.s32.totalorder %s20_s10, %s124_s20  ;;  %p130_p5 = scmp.lt.s32.totalorder %s124_s20, %s124_s20 }
   0xd   :  { %p131_p6 = por %p130_p5, %p129_p4 }
   0xf   :  { %p132_p7 = pnand %p131_p6, %p125_p3 }
  0x11   :  { %135 = shalt.err (!%p132_p7)
}
  0x12   :  { %22 = dma.hbm_to_vmem [thread:$0]  %s241_s0, 128, %s20_s10, [#allocation3]  }
  0x13   :  { %s136_s25 = scalar_lea.hbm %s242_s1, 128 }
  0x14   :  { %p137_p8 = scmp.ne.s32.totalorder %s242_s1, %s136_s25  ;;  %p140_p9 = scmp.lt.u32.totalorder %s136_s25, %s242_s1 }
  0x16   :  { %p142_p10 = pnand %p140_p9, %p137_p8 }
  0x18   :  { %145 = shalt.err (!%p142_p10)
}
  0x19   :  { %s146_s30 = scalar_lea.vmem %s33_s12, 128  ;;  %p151_p12 = scmp.lt.s32.totalorder %s33_s12, %s33_s12 }
  0x1a   :  { %p147_p11 = scmp.ne.s32.totalorder %s33_s12, %s146_s30  ;;  %p152_p13 = scmp.lt.s32.totalorder %s146_s30, %s146_s30 }
  0x1c   :  { %p153_p0 = por %p152_p13, %p151_p12 }
  0x1e   :  { %p154_p1 = pnand %p153_p0, %p147_p11 }
  0x20   :  { %157 = shalt.err (!%p154_p1)
}
  0x21   :  { %35 = dma.hbm_to_vmem [thread:$0]  %s242_s1, 128, %s33_s12, [#allocation6]  }
  0x22   :  { %180 = dma.done.wait [#allocation3], 128  }
  0x23   :  { %181 = vsyncadd [#allocation3], 4294967168 }
  0x24   :  { %182 = dma.done.wait [#allocation6], 128  }
  0x25   :  { %183 = vsyncadd [#allocation6], 4294967168  ;;  %v188_v0 = vmov 0.0   ;;  %vm51_vm0 = vcmask 261120   ;;  %v49_v1 = vld [vmem:[#allocation2] sm:$0xff]  ;;  %v50_v3 = vld [vmem:[#allocation5] sm:$0xff] }
  0x26   :  { %48 = vst [vmem:[#allocation7] sm:$0x1] %v188_v0  ;;  %v52_v2 = vsel %vm51_vm0, %v49_v1, -inf  ;;  %v67_v4 = vsel %vm51_vm0, %v50_v3, 0.0  ;;  %v63_v5 = vmul.f32 %v50_v3, %v49_v1  ;;  %vm74_vm1 = vcmask 7168   ;;  %s189_s1 = smov [#allocation7]  }
  0x27   :  { %53 = vmax.xlane.f32.xlu0 %v52_v2  ;;  %68 = vadd.xlane.f32.xlu1 %v67_v4  ;;  %s94_s4 = sshll.u32 %s189_s1, 4  ;;  %s95_s4 = int_to_ptr.vmem [resolvable:$true] %s94_s4 }
  0x28   :  { %v64_v6 = vsel %vm51_vm0, %v63_v5, 0.0  ;;  %s158_s6 = scalar_lea.vmem %s95_s4, 16  ;;  %s162_s7 = scalar_lea.vmem %s95_s4, 32 }
  0x29   :  { %p159_p2 = scmp.ne.s32.totalorder %s95_s4, %s158_s6  ;;  %p163_p3 = scmp.lt.s32.totalorder %s95_s4, %s95_s4 }
  0x2a   :  { %p164_p4 = scmp.lt.s32.totalorder %s162_s7, %s158_s6 }
  0x2b   :  { %65 = vadd.xlane.f32.xlu1 %v64_v6 }
  0x2c   :  { %p165_p5 = por %p164_p4, %p163_p3 }
  0x2d   :  { %v73_v28 = vld [vmem:[#allocation7] sm:$0x1] }
  0x2e   :  { %p166_p6 = pnand %p165_p5, %p159_p2 }
  0xb4   :  { %v54_v7 = vpop.xlane.xlu0 %53  ;;  %v69_v13 = vpop.xlane.xlu1 %68 }
  0xb5   :  { %v55_v8 = vsub.f32 %v49_v1, %v54_v7 }
  0xb7   :  { %v56_v9 = vmul.f32 1.442695, %v55_v8 }
  0xb8   :  { %v66_v17 = vpop.xlane.xlu1 %65 }
  0xb9   :  { %110 = vpow2.f32 %v56_v9 }
  0xc3   :  { %v111_v10 = vpop.eup %110 }
  0xc4   :  { %v58_v11 = vsel %vm51_vm0, %v111_v10, 0.0 }
  0xc5   :  { %59 = vadd.xlane.f32.xlu0 %v58_v11 }
 0x152   :  { %v60_v12 = vpop.xlane.xlu0 %59 }
 0x153   :  { %112 = vlog2.f32 %v60_v12 }
 0x15d   :  { %v113_v14 = vpop.eup %112 }
 0x15e   :  { %v62_v15 = vmul.f32 0.6931472, %v113_v14 }
 0x160   :  { %v70_v16 = vadd.f32 %v62_v15, %v54_v7 }
 0x162   :  { %v71_v18 = vmul.f32 %v70_v16, %v69_v13 }
 0x164   :  { %v72_v19 = vsub.f32 %v66_v17, %v71_v18 }
 0x166   :  { %v75_v20 = vsel %vm74_vm1, %v72_v19, 0.0 }
 0x167   :  { %76 = vadd.xlane.f32.xlu0 %v75_v20 }
 0x1f4   :  { %v77_v21 = vpop.xlane.xlu0 %76 }
 0x1f5   :  { %v78_v22 = vrot.slane %v77_v21, 4 }
 0x1f7   :  { %v79_v23 = vadd.f32 %v78_v22, %v77_v21 }
 0x1f9   :  { %v80_v24 = vrot.slane %v79_v23, 2 }
 0x1fb   :  { %v81_v25 = vadd.f32 %v80_v24, %v79_v23 }
 0x1fd   :  { %v82_v26 = vrot.slane %v81_v25, 1 }
 0x1ff   :  { %v83_v27 = vadd.f32 %v82_v26, %v81_v25 }
 0x201   :  { %104 = vpush %v83_v27 }
 0x232   :  { %s105_s5 = spop %104 }
 0x233   :  { %v85_v29 = vstv %s105_s5 }
 0x234   :  { %v86_v30 = vadd.f32 %v85_v29, %v73_v28 }
 0x236   :  { %87 = vst [vmem:[#allocation7] sm:$0x1] %v86_v30 }
 0x237   :  { %169 = shalt.err (!%p166_p6)
}
 0x238   :  { %s170_s10 = scalar_lea.hbm %s243_s2, 16 }
 0x239   :  { %p171_p7 = scmp.ne.s32.totalorder %s243_s2, %s170_s10  ;;  %p174_p8 = scmp.lt.u32.totalorder %s170_s10, %s243_s2 }
 0x23b   :  { %p176_p9 = pnand %p174_p8, %p171_p7 }
 0x23d   :  { %179 = shalt.err (!%p176_p9)
}
 0x23e   :  { %97 = dma.vmem_to_hbm [thread:$0]  %s95_s4, 16, %s243_s2, [#allocation4]  }
 0x23f   :  { %184 = dma.done.wait [#allocation4], 16  }
 0x240   :  { %185 = vsyncadd [#allocation4], 4294967280 }
 0x241   :  { %101 = vsyncpa [#allocation3], 1 }
 0x242   :  { %102 = vsyncpa [#allocation6], 1 }
 0x243   :  { %103 = vsyncpa [#allocation4], 1 }

</bundles_post_ra>
